<compile_context>
chip_gen: v6e
topology: v6e:2x2x1
jax: 0.10.0
libtpu: 0.0.40
codegen_flags: <defaults>
</compile_context>

<pallas_src>
import functools

import jax
import jax.numpy as jnp
import numpy as np
from jax.experimental import pallas as pl
from jax.experimental.pallas import tpu as pltpu


def _mean_readout_kernel(idx_ref, h_ref, inv_ref, out_ref, acc_ref, *,
                         n_total, ragged):
    """Segment-mean over node tiles (reduction axis = grid axis 1).

    idx_ref : (1, tile_n) int32      -- graph id per node (lane-dense)
    h_ref   : (tile_n, tile_d)       -- node feature tile (input dtype)
    inv_ref : (B, 1) float32         -- 1 / max(count_per_graph, 1)
    out_ref : (B, tile_d) h.dtype    -- final per-graph mean
    acc_ref : (B, tile_d) float32    -- VMEM accumulator scratch
    """
    ni = pl.program_id(1)
    tile_n = h_ref.shape[0]
    num_graphs = out_ref.shape[0]

    @pl.when(ni == 0)
    def _():
        acc_ref[...] = jnp.zeros_like(acc_ref)

    idx_row = idx_ref[...]                                         # (1, tile_n)
    graph_iota = jax.lax.broadcasted_iota(jnp.int32, (num_graphs, tile_n), 0)
    one_hot = graph_iota == idx_row                                # (B, tile_n) bool

    h_tile = h_ref[...]                                            # (tile_n, tile_d)
    if ragged:
        # Last node tile is partial: mask invalid lanes of one_hot (garbage
        # indices) AND zero the invalid h rows (garbage features; required so
        # NaN/Inf in the stale tile tail cannot reach the MXU accumulation).
        base = ni * tile_n
        lane_pos = base + jax.lax.broadcasted_iota(jnp.int32, (1, tile_n), 1)
        one_hot = jnp.logical_and(one_hot, lane_pos < n_total)
        row_pos = base + jax.lax.broadcasted_iota(jnp.int32, (tile_n, 1), 0)
        h_tile = jnp.where(row_pos < n_total, h_tile, jnp.zeros_like(h_tile))

    # segment-sum via (B, tile_n) @ (tile_n, tile_d) on the MXU, f32 accumulate.
    acc_ref[...] += jax.lax.dot_general(
        one_hot.astype(h_tile.dtype), h_tile,
        (((1,), (0,)), ((), ())),
        preferred_element_type=jnp.float32)                        # (B, tile_d)

    @pl.when(ni == pl.num_programs(1) - 1)
    def _():
        out_ref[...] = (acc_ref[...] * inv_ref[...]).astype(out_ref.dtype)


def _tpu_chip_params():
    """(vmem_capacity_bytes, num_tensorcores) with conservative fallbacks."""
    vmem_cap = 64 * 1024 * 1024          # conservative default (v7x per-TC)
    num_tc = 1
    try:
        info = pltpu.get_tpu_info()
        vmem_cap = int(getattr(info, "vmem_capacity_bytes", vmem_cap))
    except Exception:
        pass
    try:
        kind = jax.devices()[0].device_kind.lower()
        if "7x" in kind or "v7" in kind:   # v7x-class: 2 TensorCores per chip
            num_tc = 2
    except Exception:
        pass
    return vmem_cap, max(num_tc, 1)


def mean_readout(h, index, num_graphs, *, target_tile_n=1024, force_tile_n=None):
    """JAX/Pallas equivalent of MeanReadout.forward (global mean pool)."""
    if isinstance(h, (list, tuple)):
        h = h[-1]
    h = jnp.asarray(h)
    assert h.ndim == 2
    n, d = h.shape
    index_flat = jnp.asarray(index).astype(jnp.int32).reshape(n)
    index2d = index_flat.reshape(1, n)

    # Per-graph counts / inverse counts (wrapper side; N ints -> trivially cheap).
    # NOTE: empty graphs produce a mean of 0 (not NaN), matching global_mean_pool.
    counts = jax.ops.segment_sum(jnp.ones((n,), jnp.float32), index_flat,
                                 num_segments=num_graphs)
    inv_cnt = (1.0 / jnp.maximum(counts, 1.0)).reshape(num_graphs, 1)

    itemsize = jnp.dtype(h.dtype).itemsize
    vmem_cap, num_tc = _tpu_chip_params()
    b_pad = max(num_graphs, 8)

    # ---- feature-dim tiling --------------------------------------------------
    # Split d only on 2-TC chips (v7x): even number of 128-aligned tiles so the
    # "parallel" axis balances both cores.  Single-TC chips keep tile_d = d.
    tile_d = d
    if num_tc >= 2:
        for cand in (d // 2, d // 4):
            if cand >= 128 and cand % 128 == 0 and d % cand == 0:
                tile_d = cand
                break

    def _max_tile_n(td):
        out_bytes = 2 * b_pad * td * itemsize + b_pad * td * 4 + b_pad * 512
        budget = int(0.40 * vmem_cap) - out_bytes
        return max((budget // (2 * td * itemsize)) // 128 * 128, 0)

    # Split the feature dim further only if VMEM cannot hold a >=512-row h tile.
    while _max_tile_n(tile_d) < 512 and tile_d % 256 == 0:
        tile_d //= 2

    # ---- node-dim tiling (reduction axis; as large as the budget allows) ----
    tile_n = int(min(target_tile_n, max(_max_tile_n(tile_d), 128)))
    if force_tile_n is not None:
        tile_n = int(force_tile_n)
    if n <= tile_n:
        tile_n = n                      # single full block; no ragged handling
    ragged = (n % tile_n) != 0

    grid = (d // tile_d, pl.cdiv(n, tile_n))

    est_vmem = (2 * tile_n * tile_d * itemsize            # double-buffered h tile
                + 2 * 8 * pl.cdiv(tile_n, 128) * 128 * 4  # double-buffered idx
                + 2 * b_pad * tile_d * itemsize           # double-buffered out blk
                + b_pad * tile_d * 4                      # f32 accumulator scratch
                + b_pad * 512                             # inv counts
                + (4 << 20))                              # one_hot vregs / slack
    vmem_limit = int(min(max(0.5 * vmem_cap, est_vmem + (2 << 20)),
                         vmem_cap - (4 << 20)))

    kernel = functools.partial(_mean_readout_kernel, n_total=n, ragged=ragged)

    return pl.pallas_call(
        kernel,
        out_shape=jax.ShapeDtypeStruct((num_graphs, d), h.dtype),
        grid_spec=pltpu.PrefetchScalarGridSpec(
            num_scalar_prefetch=0,
            grid=grid,
            in_specs=[
                pl.BlockSpec((1, tile_n), lambda di, ni: (0, ni)),        # index
                pl.BlockSpec((tile_n, tile_d), lambda di, ni: (ni, di)),  # h tile
                pl.BlockSpec((num_graphs, 1), lambda di, ni: (0, 0)),     # 1/count
            ],
            out_specs=pl.BlockSpec((num_graphs, tile_d),
                                   lambda di, ni: (0, di)),
            scratch_shapes=[pltpu.VMEM((num_graphs, tile_d), jnp.float32)],
        ),
        compiler_params=pltpu.CompilerParams(
            # feature tiles are independent ("parallel", sharded across TCs on
            # v7x); node tiles are the reduction axis ("arbitrary", last).
            dimension_semantics=("parallel", "arbitrary"),
            vmem_limit_bytes=vmem_limit),
    )(index2d, h, inv_cnt)


if __name__ == "__main__":
    key = jax.random.PRNGKey(0)
    k1, k2, k3 = jax.random.split(key, 3)

    def ref_mean_pool(hh, idx, b):
        oh = jax.nn.one_hot(idx, b, dtype=jnp.float32)               # (N, B)
        sums = oh.T @ hh.astype(jnp.float32)                         # (B, D)
        cnts = jnp.maximum(oh.sum(axis=0, keepdims=True).T, 1.0)     # (B, 1)
        return sums / cnts

    # Case 1: list input (MeanReadout uses h[-1]); single full node block.
    N, D, B = 100, 32, 2
    h_last = jax.random.normal(k1, (N, D), dtype=jnp.float32)
    h_list = [jax.random.normal(k2, (N, D), dtype=jnp.float32), h_last]
    index = jnp.concatenate(
        [jnp.zeros(60, dtype=jnp.int32), jnp.ones(40, dtype=jnp.int32)])
    y = jax.block_until_ready(mean_readout(h_list, index, B))
    np.testing.assert_allclose(np.asarray(y),
                               np.asarray(ref_mean_pool(h_last, index, B)),
                               rtol=1e-5, atol=1e-5)
    assert y.shape == (B, D) and y.dtype == h_last.dtype

    # Case 2: ragged node tiling (N not a multiple of tile_n) exercises the
    # in-kernel row-validity masks (no wrapper-side padding of h).
    N2, D2, B2 = 300, 32, 3
    h2 = jax.random.normal(k3, (N2, D2), dtype=jnp.float32)
    index2 = jnp.sort(jax.random.randint(jax.random.PRNGKey(1), (N2,), 0, B2))
    y2 = jax.block_until_ready(mean_readout(h2, index2, B2, force_tile_n=128))
    np.testing.assert_allclose(np.asarray(y2),
                               np.asarray(ref_mean_pool(h2, index2, B2)),
                               rtol=1e-5, atol=1e-5)

    print("KERNEL_OK")
</pallas_src>

<mosaic_0001>
module attributes {stable_mosaic.version = 11 : i64} {
  func.func @_mean_readout_kernel(%arg0: i32, %arg1: i32, %arg2: memref<1x100xi32, #tpu.memory_space<vmem>>, %arg3: memref<100x32xf32, #tpu.memory_space<vmem>>, %arg4: memref<2x1xf32, #tpu.memory_space<vmem>>, %arg5: memref<2x32xf32, #tpu.memory_space<vmem>>, %arg6: memref<2x32xf32, #tpu.memory_space<vmem>>) attributes {dimension_semantics = [#tpu.dimension_semantics<parallel>, #tpu.dimension_semantics<arbitrary>], iteration_bounds = array<i64: 1, 1>, scalar_prefetch = 0 : i64, scratch_operands = 1 : i64, tpu.core_type = #tpu.core_type<tc>, window_params = [{transform_indices = @transform_0, window_bounds = array<i64: 1, 100>}, {transform_indices = @transform_1, window_bounds = array<i64: 100, 32>}, {pipeline_mode = #tpu.pipeline_mode<synchronous>, transform_indices = @transform_2, window_bounds = array<i64: 2, 1>}, {transform_indices = @transform_3, window_bounds = array<i64: 2, 32>}]} {
    %c0_i32 = arith.constant 0 : i32
    %0 = arith.cmpi eq, %arg1, %c0_i32 : i32
    %1 = arith.extui %0 : i1 to i32
    %c0_i32_0 = arith.constant 0 : i32
    %2 = arith.cmpi ne, %1, %c0_i32_0 : i32
    scf.if %2 {
      %cst_10 = arith.constant 0.000000e+00 : f32
      %17 = vector.broadcast %cst_10 : f32 to vector<2x32xf32>
      %c0_11 = arith.constant 0 : index
      %c0_12 = arith.constant 0 : index
      %18 = vector.load %arg6[%c0_11, %c0_12] : memref<2x32xf32, #tpu.memory_space<vmem>>, vector<2x32xf32>
      tpu.vector_store %arg6[%c0_11, %c0_12], %17 {strides = array<i32>} : memref<2x32xf32, #tpu.memory_space<vmem>>, vector<2x32xf32>,
    } else {
    }
    %c0 = arith.constant 0 : index
    %c0_1 = arith.constant 0 : index
    %3 = vector.load %arg2[%c0, %c0_1] : memref<1x100xi32, #tpu.memory_space<vmem>>, vector<1x100xi32>
    %4 = tpu.iota {dimensions = array<i32: 0>} : vector<2x100xi32>
    %5 = vector.broadcast %3 : vector<1x100xi32> to vector<2x100xi32>
    %6 = arith.cmpi eq, %4, %5 : vector<2x100xi32>
    %c0_2 = arith.constant 0 : index
    %c0_3 = arith.constant 0 : index
    %7 = vector.load %arg3[%c0_2, %c0_3] : memref<100x32xf32, #tpu.memory_space<vmem>>, vector<100x32xf32>
    %c0_4 = arith.constant 0 : index
    %c0_5 = arith.constant 0 : index
    %8 = vector.load %arg6[%c0_4, %c0_5] : memref<2x32xf32, #tpu.memory_space<vmem>>, vector<2x32xf32>
    %9 = arith.extui %6 : vector<2x100xi1> to vector<2x100xi32>
    %10 = arith.sitofp %9 : vector<2x100xi32> to vector<2x100xf32>
    %cst = arith.constant dense<0.000000e+00> : vector<2x32xf32>
    %11 = tpu.matmul %10, %7, %cst {dimension_numbers = #tpu.dot_dimension_numbers<[1], [0], [0], [1], [0, 0, 1, 1], [], []>} : vector<2x100xf32>, vector<100x32xf32>, vector<2x32xf32> -> vector<2x32xf32>
    %12 = arith.addf %8, %11 : vector<2x32xf32>
    %c0_6 = arith.constant 0 : index
    %c0_7 = arith.constant 0 : index
    %13 = vector.load %arg6[%c0_6, %c0_7] : memref<2x32xf32, #tpu.memory_space<vmem>>, vector<2x32xf32>
    tpu.vector_store %arg6[%c0_6, %c0_7], %12 {strides = array<i32>} : memref<2x32xf32, #tpu.memory_space<vmem>>, vector<2x32xf32>,
    %c0_i32_8 = arith.constant 0 : i32
    %14 = arith.cmpi eq, %arg1, %c0_i32_8 : i32
    %15 = arith.extui %14 : i1 to i32
    %c0_i32_9 = arith.constant 0 : i32
    %16 = arith.cmpi ne, %15, %c0_i32_9 : i32
    scf.if %16 {
      %c0_10 = arith.constant 0 : index
      %c0_11 = arith.constant 0 : index
      %17 = vector.load %arg6[%c0_10, %c0_11] : memref<2x32xf32, #tpu.memory_space<vmem>>, vector<2x32xf32>
      %c0_12 = arith.constant 0 : index
      %c0_13 = arith.constant 0 : index
      %18 = vector.load %arg4[%c0_12, %c0_13] : memref<2x1xf32, #tpu.memory_space<vmem>>, vector<2x1xf32>
      %19 = vector.broadcast %18 : vector<2x1xf32> to vector<2x32xf32>
      %20 = arith.mulf %17, %19 : vector<2x32xf32>
      %c0_14 = arith.constant 0 : index
      %c0_15 = arith.constant 0 : index
      %21 = vector.load %arg5[%c0_14, %c0_15] : memref<2x32xf32, #tpu.memory_space<vmem>>, vector<2x32xf32>
      tpu.vector_store %arg5[%c0_14, %c0_15], %20 {strides = array<i32>} : memref<2x32xf32, #tpu.memory_space<vmem>>, vector<2x32xf32>,
    } else {
    }
    return
  }
  func.func @transform_0(%arg0: i32, %arg1: i32) -> (i32, i32) {
    %c0_i32 = arith.constant 0 : i32
    %c0_i32_0 = arith.constant 0 : i32
    return %c0_i32, %arg1 : i32, i32
  }
  func.func @transform_1(%arg0: i32, %arg1: i32) -> (i32, i32) {
    %c0_i32 = arith.constant 0 : i32
    return %arg1, %arg0 : i32, i32
  }
  func.func @transform_2(%arg0: i32, %arg1: i32) -> (i32, i32) {
    %c0_i32 = arith.constant 0 : i32
    %c0_i32_0 = arith.constant 0 : i32
    %c0_i32_1 = arith.constant 0 : i32
    return %c0_i32, %c0_i32_0 : i32, i32
  }
  func.func @transform_3(%arg0: i32, %arg1: i32) -> (i32, i32) {
    %c0_i32 = arith.constant 0 : i32
    %c0_i32_0 = arith.constant 0 : i32
    return %c0_i32, %arg0 : i32, i32
  }
}

</mosaic_0001>

<bundles_post_ra>
// kernel: tpu_custom_call.1
= control target key start
LH: loop header
LB: loop body
LE: loop exit
PB: predicated region body
PF: predicated region fallthrough
CT: control target
= control target key end

     0   :  { %vm49_vm0 = vcmask 1043456   ;;  %v226_v1 = vmov 0.0   ;;  %vm227_vm1 = vmmov 0   ;;  %vm19_vm2 = vcmask 254976   ;;  %s301_s0 = inlined_call_operand.vmem [shape: s32[1,100], index: 0, kind: input, shape index: {}]   ;;  %s302_s1 = inlined_call_operand.vmem [shape: f32[100,32], index: 1, kind: input, shape index: {}]   ;;  %s303_s2 = inlined_call_operand.vmem [shape: f32[2,1], index: 2, kind: input, shape index: {}]   ;;  %s304_s3 = inlined_call_operand.hbm [shape: f32[2,32], index: 3, kind: output, shape index: {}]  }
   0x1   :  { %v41_v0 = vld [vmem:[%s302_s1 + $0x60] sm:$0xf]  ;;  %170 = vmatprep.subr.mxu0 %v226_v1  ;;  %v40_v2 = vld [vmem:[%s302_s1 + $0x58] sm:$0xff]  ;;  %196 = vmatprep.mubr.msk.f32.mxu0 %vm227_vm1, %v226_v1  ;;  %v39_v3 = vld [vmem:[%s302_s1 + $0x50] sm:$0xff]  ;;  %v228_v4 = vmov 0  }
   0x2   :  { %171 = vmatpush3.msk.msra.mxu0 %vm49_vm0, %v41_v0  ;;  %203 = vset.pattern.permute.xlu0 %v228_v4  ;;  %20 = vst.msk [vmem:[#allocation2] sm:$0x3] %vm19_vm2, %v226_v1  ;;  %v130_v5 = vld [vmem:[%s303_s2] sm:$0x3]  ;;  %v38_v6 = vld [vmem:[%s302_s1 + $0x48] sm:$0xff] }
   0x3   :  { %172 = vmatprep.subr.mxu0 %v226_v1  ;;  %133 = vperm.xlu0 %203, %v130_v5  }
   0x4   :  { %173 = vmatpush3.msra.mxu0 %v40_v2 }
   0x5   :  { %174 = vmatprep.subr.mxu0 %v226_v1 }
   0x6   :  { %8 = vsyncpa [#allocation4], 0  ;;  %175 = vmatpush3.msra.mxu0 %v39_v3  ;;  %v37_v7 = vld [vmem:[%s302_s1 + $0x40] sm:$0xff]  ;;  %v36_v8 = vld [vmem:[%s302_s1 + $0x38] sm:$0xff]  ;;  %v22_v11 = vlaneseq  ;;  %vm45_vm4 = vcmask 818176  }
   0x7   :  { %176 = vmatprep.subr.mxu0 %v226_v1  ;;  %v35_v9 = vld [vmem:[%s302_s1 + $0x30] sm:$0xff]  ;;  %v34_v10 = vld [vmem:[%s302_s1 + $0x28] sm:$0xff]  ;;  %v33_v12 = vld [vmem:[%s302_s1 + $0x20] sm:$0xff] }
   0x8   :  { %177 = vmatpush3.msra.mxu0 %v38_v6  ;;  %v32_v13 = vld [vmem:[%s302_s1 + $0x18] sm:$0xff]  ;;  %v23_v14 = vshrl.u32 %v22_v11, 7  ;;  %v152_v15 = vld [vmem:[%s301_s0] ss:$0 sm:$0xff]  ;;  %v31_v16 = vld [vmem:[%s302_s1 + $0x10] sm:$0xff]  ;;  %s229_s0 = smov [#allocation3]  }
   0x9   :  { %178 = vmatprep.subr.mxu0 %v226_v1  ;;  %v30_v17 = vld [vmem:[%s302_s1 + $0x8] sm:$0xff]  ;;  %v29_v18 = vld [vmem:[%s302_s1] sm:$0xff]  ;;  %s144_s14 = sshll.u32 %s229_s0, 4  ;;  %s145_s14 = int_to_ptr.vmem [resolvable:$true] %s144_s14 }
   0xa   :  { %179 = vmatpush3.msra.mxu0 %v37_v7  ;;  %vm28_vm3 = vcmp.eq.s32.totalorder %v23_v14, %v152_v15  ;;  %v42_v20 = vld [vmem:[#allocation2] sm:$0x3]  ;;  %s204_s1 = scalar_lea.vmem %s145_s14, 32  ;;  %p209_p1 = scmp.lt.s32.totalorder %s145_s14, %s145_s14 }
   0xb   :  { %180 = vmatprep.subr.mxu0 %v226_v1  ;;  %v153_v19 = vsel %vm28_vm3, 1.0, %v226_v1  ;;  %p205_p0 = scmp.ne.s32.totalorder %s145_s14, %s204_s1  ;;  %p210_p2 = scmp.lt.s32.totalorder %s204_s1, %s204_s1 }
   0xc   :  { %181 = vmatpush3.msra.mxu0 %v36_v8 }
   0xd   :  { %182 = vmatprep.subr.mxu0 %v226_v1  ;;  %p211_p3 = por %p210_p2, %p209_p1 }
   0xe   :  { %183 = vmatpush3.msra.mxu0 %v35_v9 }
   0xf   :  { %184 = vmatprep.subr.mxu0 %v226_v1  ;;  %p212_p4 = pnand %p211_p3, %p205_p0 }
  0x10   :  { %185 = vmatpush3.msra.mxu0 %v34_v10 }
  0x11   :  { %186 = vmatprep.subr.mxu0 %v226_v1 }
  0x12   :  { %187 = vmatpush3.msra.mxu0 %v33_v12 }
  0x13   :  { %188 = vmatprep.subr.mxu0 %v226_v1 }
  0x14   :  { %189 = vmatpush3.msra.mxu0 %v32_v13 }
  0x15   :  { %190 = vmatprep.subr.mxu0 %v226_v1 }
  0x16   :  { %191 = vmatpush3.msra.mxu0 %v31_v16 }
  0x17   :  { %192 = vmatprep.subr.mxu0 %v226_v1 }
  0x18   :  { %193 = vmatpush3.msra.mxu0 %v30_v17 }
  0x19   :  { %194 = vmatprep.subr.mxu0 %v226_v1 }
  0x1a   :  { %195 = vmatpush3.msra.mxu0 %v29_v18 }
  0x1b   :  { %197 = vmatmul.mubr.msk.f32.vlgmr.msra.gmra.mxu0 %vm45_vm4, %v153_v19 }
  0x7e   :  { %v134_v24 = vpop.permute.xlu0 %133 }
  0xdb   :  { %v119_v21 = vpop.f32.mrf.mxu0 }
  0xdc   :  { %v123_v22 = vadd.f32 %v119_v21, %v42_v20 }
  0xdd   :  { %v198_v23 = vpop.f32.mrf.mxu0 }
  0xde   :  { %125 = vst.msk [vmem:[#allocation2] sm:$0x3] %vm19_vm2, %v123_v22 }
  0xe5   :  { %v129_v25 = vld [vmem:[#allocation2] sm:$0x3] }
  0xe6   :  { %v136_v26 = vmul.f32 %v134_v24, %v129_v25 }
  0xe8   :  { %137 = vst.msk [vmem:[#allocation3] sm:$0x3] %vm19_vm2, %v136_v26 }
  0xe9   :  { %215 = shalt.err (!%p212_p4)
}
  0xea   :  { %147 = dma.vmem_to_hbm [thread:$0]  %s145_s14, 32, %s304_s3, [#allocation4]  }
  0xeb   :  { %224 = dma.done.wait [#allocation4], 32  }
  0xec   :  { %225 = vsyncadd [#allocation4], 4294967264 }
  0xed   :  { %151 = vsyncpa [#allocation4], 1 }

</bundles_post_ra>
